<compile_context>
chip_gen: v7x
topology: tpu7x:2x2x1
jax: 0.10.0
libtpu: 0.0.40
codegen_flags: <defaults>
</compile_context>

<pallas_src>
import functools

import jax
import jax.numpy as jnp
from jax.experimental import pallas as pl
from jax.experimental.pallas import tpu as pltpu


def _embed_kernel(idx_ref, table_ref, out_ref):
    # idx_ref:   (chunk, 1) int32  -- token ids for this chunk
    # table_ref: (V, V)     f32    -- full embedding table, VMEM-resident
    # out_ref:   (chunk, V) f32    -- gathered logits (lane-dense block)
    ids = idx_ref[...]                                                  # (chunk, 1)
    cols = jax.lax.broadcasted_iota(jnp.int32, out_ref.shape, 1)        # (chunk, V)
    one_hot = (cols == ids).astype(table_ref.dtype)                     # (chunk, V)
    out_ref[...] = jnp.dot(
        one_hot,
        table_ref[...],
        preferred_element_type=jnp.float32,
        precision=jax.lax.Precision.HIGHEST,
    ).astype(out_ref.dtype)


@functools.partial(jax.jit, static_argnames=("token_chunk",))
def bigram_nnlm_forward(idx: jax.Array, table: jax.Array, *, token_chunk: int = 512) -> jax.Array:
    """Equivalent of BigramNNLM.forward: table[idx] with idx of shape (B, T)."""
    B, T = idx.shape
    V = table.shape[1]
    n_tokens = B * T

    # Clamp ids so a corrupt token id can never turn into an OOB access.
    flat_idx = jnp.clip(idx.reshape(n_tokens).astype(jnp.int32), 0, V - 1)

    # One grid step per `chunk` tokens. For small inputs this is a single step
    # with zero padding; for large inputs chunks are 8-aligned and padded.
    chunk = min(token_chunk, n_tokens)
    n_padded = ((n_tokens + chunk - 1) // chunk) * chunk
    if n_padded != n_tokens:
        flat_idx = jnp.pad(flat_idx, (0, n_padded - n_tokens))
    idx2d = flat_idx.reshape(n_padded, 1)

    # TODO(synk): for vocabularies where the V x V table no longer fits in VMEM
    # (roughly V > ~3000 f32 on v7x's 64 MiB), switch to a V-tiled one-hot
    # matmul / manual multi-row DMA gather instead of keeping it resident.
    table_bytes = V * V * table.dtype.itemsize
    out_block_bytes = chunk * V * 4
    vmem_limit = min(int(2 * table_bytes + 4 * out_block_bytes + (8 << 20)), 48 << 20)

    out_flat = pl.pallas_call(
        _embed_kernel,
        out_shape=jax.ShapeDtypeStruct((n_padded, V), table.dtype),
        grid=(n_padded // chunk,),
        in_specs=[
            pl.BlockSpec((chunk, 1), lambda i: (i, 0)),   # token ids for this chunk
            pl.BlockSpec((V, V), lambda i: (0, 0)),       # full table, stays resident
        ],
        out_specs=pl.BlockSpec((chunk, V), lambda i: (i, 0)),
        compiler_params=pltpu.CompilerParams(
            dimension_semantics=("parallel",),            # chunks independent; v7x uses both TCs
            vmem_limit_bytes=vmem_limit,
        ),
    )(idx2d, table)

    return out_flat[:n_tokens].reshape(B, T, V)


if __name__ == "__main__":
    vocab_size = 65   # e.g. tiny-shakespeare character vocab
    batch, seq = 2, 8

    key = jax.random.PRNGKey(0)
    k_table, k_idx = jax.random.split(key)

    # nn.Embedding default init: N(0, 1)
    table = jax.random.normal(k_table, (vocab_size, vocab_size), dtype=jnp.float32)
    idx = jax.random.randint(k_idx, (batch, seq), 0, vocab_size, dtype=jnp.int32)

    logits = bigram_nnlm_forward(idx, table)
    logits = jax.block_until_ready(logits)

    # Reference check against plain JAX gather.
    ref = table[idx]
    assert logits.shape == (batch, seq, vocab_size)
    assert jnp.allclose(logits, ref, atol=1e-5, rtol=1e-5), "Pallas embedding lookup mismatch"

    # TODO(synk): `generate` uses a host-side torch.multinomial sampling loop;
    # not a kernel hot path, left unimplemented.
    print("KERNEL_OK")
</pallas_src>

<mosaic_0001>
module attributes {stable_mosaic.version = 11 : i64} {
  func.func @_embed_kernel(%arg0: i32, %arg1: memref<16x1xi32, #tpu.memory_space<vmem>>, %arg2: memref<65x65xf32, #tpu.memory_space<vmem>>, %arg3: memref<16x65xf32, #tpu.memory_space<vmem>>) attributes {dimension_semantics = [#tpu.dimension_semantics<parallel>], iteration_bounds = array<i64: 1>, scalar_prefetch = 0 : i64, scratch_operands = 0 : i64, tpu.core_type = #tpu.core_type<tc>, window_params = [{transform_indices = @transform_0, window_bounds = array<i64: 16, 1>}, {pipeline_mode = #tpu.pipeline_mode<synchronous>, transform_indices = @transform_1, window_bounds = array<i64: 65, 65>}, {transform_indices = @transform_2, window_bounds = array<i64: 16, 65>}]} {
    %c0 = arith.constant 0 : index
    %c0_0 = arith.constant 0 : index
    %0 = vector.load %arg1[%c0, %c0_0] : memref<16x1xi32, #tpu.memory_space<vmem>>, vector<16x1xi32>
    %1 = tpu.iota {dimensions = array<i32: 1>} : vector<16x65xi32>
    %2 = vector.broadcast %0 : vector<16x1xi32> to vector<16x65xi32>
    %3 = arith.cmpi eq, %1, %2 : vector<16x65xi32>
    %4 = arith.extui %3 : vector<16x65xi1> to vector<16x65xi32>
    %5 = arith.sitofp %4 : vector<16x65xi32> to vector<16x65xf32>
    %c0_1 = arith.constant 0 : index
    %c0_2 = arith.constant 0 : index
    %6 = vector.load %arg2[%c0_1, %c0_2] : memref<65x65xf32, #tpu.memory_space<vmem>>, vector<65x65xf32>
    %cst = arith.constant dense<0.000000e+00> : vector<16x65xf32>
    %7 = tpu.matmul %5, %6, %cst {dimension_numbers = #tpu.dot_dimension_numbers<[1], [0], [0], [1], [0, 0, 1, 1], [], []>, precision = #tpu.contract_precision<fp32>} : vector<16x65xf32>, vector<65x65xf32>, vector<16x65xf32> -> vector<16x65xf32>
    %c0_3 = arith.constant 0 : index
    %c0_4 = arith.constant 0 : index
    %8 = vector.load %arg3[%c0_3, %c0_4] : memref<16x65xf32, #tpu.memory_space<vmem>>, vector<16x65xf32>
    tpu.vector_store %arg3[%c0_3, %c0_4], %7 {strides = array<i32>} : memref<16x65xf32, #tpu.memory_space<vmem>>, vector<16x65xf32>,
    return
  }
  func.func @transform_0(%arg0: i32) -> (i32, i32) {
    %c0_i32 = arith.constant 0 : i32
    %c0_i32_0 = arith.constant 0 : i32
    return %arg0, %c0_i32 : i32, i32
  }
  func.func @transform_1(%arg0: i32) -> (i32, i32) {
    %c0_i32 = arith.constant 0 : i32
    %c0_i32_0 = arith.constant 0 : i32
    %c0_i32_1 = arith.constant 0 : i32
    return %c0_i32, %c0_i32_0 : i32, i32
  }
  func.func @transform_2(%arg0: i32) -> (i32, i32) {
    %c0_i32 = arith.constant 0 : i32
    %c0_i32_0 = arith.constant 0 : i32
    return %arg0, %c0_i32 : i32, i32
  }
}

</mosaic_0001>

<bundles_post_ra>
// kernel: bigram_nnlm_forward.1
= control target key start
LH: loop header
LB: loop body
LE: loop exit
PB: predicated region body
PF: predicated region fallthrough
CT: control target
= control target key end

     0   :  { %7 = vsyncpa [#allocation3], 0  ;;  %s1173_s0 = inlined_call_operand.vmem [shape: s32[16,1], index: 0, kind: input, shape index: {}]   ;;  %s1174_s1 = inlined_call_operand.hbm [shape: f32[65,65], index: 1, kind: input, shape index: {}]   ;;  %s1175_s2 = inlined_call_operand.hbm [shape: f32[16,65], index: 2, kind: output, shape index: {}]  }
   0x1   :  { %8 = vsyncpa [#allocation4], 0  ;;  %s1035_s9 = smov [#allocation2]   ;;  %s987_s13 = scalar_lea.hbm %s1174_s1, 1152 }
   0x2   :  { %s16_s10 = sshll.u32 %s1035_s9, 4  ;;  %p988_p0 = scmp.ne.s32.totalorder %s1174_s1, %s987_s13  ;;  %s17_s10 = int_to_ptr.vmem [resolvable:$true] %s16_s10 }
   0x3   :  { %p991_p1 = scmp.lt.u32.totalorder %s987_s13, %s1174_s1 }
   0x5   :  { %p993_p2 = pnand %p991_p1, %p988_p0 }
   0x7   :  { %996 = shalt.err (!%p993_p2)
}
   0x8   :  { %s997_s18 = scalar_lea.vmem %s17_s10, 1152  ;;  %p1002_p4 = scmp.lt.s32.totalorder %s17_s10, %s17_s10 }
   0x9   :  { %p998_p3 = scmp.ne.s32.totalorder %s17_s10, %s997_s18  ;;  %p1003_p5 = scmp.lt.s32.totalorder %s997_s18, %s997_s18 }
   0xb   :  { %p1004_p6 = por %p1003_p5, %p1002_p4 }
   0xd   :  { %p1005_p7 = pnand %p1004_p6, %p998_p3 }
   0xf   :  { %1008 = shalt.err (!%p1005_p7)
}
  0x10   :  { %s1036_s19 = smov 128   ;;  %s1037_s20 = smov 8  }
  0x11   :  { %22 = dma.hbm_to_vmem [thread:$0]  %s1174_s1, 1152, %s17_s10, [#allocation3], %s1036_s19, %s1036_s19, %s1037_s20  }
  0x12   :  { %1031 = dma.done.wait [#allocation3], 1152  }
  0x13   :  { %1032 = vsyncadd [#allocation3], 4294966144  ;;  %v1038_v0 = vmov 0   ;;  %v26_v1 = vld [vmem:[%s1173_s0] sm:$0xff]  ;;  %v43_v3 = vld [vmem:[#allocation2 + $0x8] sm:$0xff]  ;;  %vm58_vm0 = vcmask 1040384  }
  0x14   :  { %986 = vset.pattern.permute.xlu0 %v1038_v0  ;;  %v42_v2 = vld [vmem:[#allocation2] sm:$0xff]  ;;  %v44_v5 = vld [vmem:[#allocation2 + $0x10] sm:$0xff]  ;;  %v45_v6 = vld [vmem:[#allocation2 + $0x18] sm:$0xff]  ;;  %v66_v8 = vand.u32 4294901760, %v43_v3  ;;  %vm51_vm1 = vcmask 531456  }
  0x15   :  { %31 = vperm.xlu0 %986, %v26_v1   ;;  %v63_v4 = vand.u32 4294901760, %v42_v2  ;;  %v27_v7 = vld [vmem:[%s1173_s0 + $0x8] sm:$0xff]  ;;  %v69_v9 = vand.u32 4294901760, %v44_v5  ;;  %v72_v10 = vand.u32 4294901760, %v45_v6  ;;  %v46_v11 = vld [vmem:[#allocation2 + $0x20] sm:$0xff]  ;;  %v48_v17 = vld [vmem:[#allocation2 + $0x30] sm:$0xff] }
  0x16   :  { %v47_v12 = vld [vmem:[#allocation2 + $0x28] sm:$0xff]  ;;  %v75_v15 = vand.u32 4294901760, %v46_v11  ;;  %v49_v18 = vld [vmem:[#allocation2 + $0x38] sm:$0xff]  ;;  %v1083_v20 = vsub.f32 %v43_v3, %v66_v8  ;;  %v81_v21 = vand.u32 4294901760, %v48_v17  ;;  %v50_v24 = vld [vmem:[#allocation2 + $0x40] sm:$0x1] }
  0x17   :  { %v1077_v13 = vpack.c.bf16 %v66_v8, %v63_v4  ;;  %v1079_v14 = vpack.c.bf16 %v72_v10, %v69_v9  ;;  %v78_v16 = vand.u32 4294901760, %v47_v12  ;;  %v1081_v19 = vsub.f32 %v42_v2, %v63_v4  ;;  %s1040_s0 = smov [#allocation5]  }
  0x18   :  { %v84_v22 = vand.u32 4294901760, %v49_v18  ;;  %v166_v26 = vand.u32 4294901760, %v1083_v20  ;;  %v172_v27 = vsub.f32 %v44_v5, %v69_v9  ;;  %v179_v28 = vsub.f32 %v45_v6, %v72_v10  ;;  %s662_s1 = sshll.u32 %s1040_s0, 4  ;;  %s663_s1 = int_to_ptr.vmem [resolvable:$true] %s662_s1 }
  0x19   :  { %34 = vperm.xlu0 %986, %v27_v7   ;;  %923 = vmatprep.subr.bf16.mxu0 %v1077_v13  ;;  %v1091_v23 = vpack.c.bf16 %v78_v16, %v75_v15  ;;  %v159_v25 = vand.u32 4294901760, %v1081_v19  ;;  %v1099_v30 = vsel %vm58_vm0, %v50_v24, 0  ;;  %v186_v39 = vsub.f32 %v46_v11, %v75_v15  ;;  %s1009_s27 = scalar_lea.vmem %s663_s1, 256  ;;  %p1014_p9 = scmp.lt.s32.totalorder %s663_s1, %s663_s1 }
  0x1a   :  { %875 = vmatprep.subr.bf16.mxu1 %v1077_v13  ;;  %925 = vmatpush3.bf16.msra.mxu0 %v1077_v13  ;;  %v1097_v29 = vpack.c.bf16 %v84_v22, %v81_v21  ;;  %v167_v32 = vsub.f32 %v1083_v20, %v166_v26  ;;  %v173_v33 = vand.u32 4294901760, %v172_v27  ;;  %v180_v34 = vand.u32 4294901760, %v179_v28  ;;  %p1010_p8 = scmp.ne.s32.totalorder %s663_s1, %s1009_s27  ;;  %p1015_p10 = scmp.lt.s32.totalorder %s1009_s27, %s1009_s27 }
  0x1b   :  { %877 = vmatpush3.bf16.msra.mxu1 %v1077_v13  ;;  %927 = vmatprep.subr.bf16.mxu0 %v1079_v14  ;;  %v160_v31 = vsub.f32 %v1081_v19, %v159_v25  ;;  %v1110_v38 = vand.u32 4294901760, %v1099_v30  ;;  %v193_v40 = vsub.f32 %v47_v12, %v78_v16  ;;  %v187_v45 = vand.u32 4294901760, %v186_v39 }
  0x1c   :  { %879 = vmatprep.subr.bf16.mxu1 %v1079_v14  ;;  %v1105_v35 = vpack.c.bf16 %v180_v34, %v173_v33  ;;  %v174_v36 = vsub.f32 %v172_v27, %v173_v33  ;;  %v181_v37 = vsub.f32 %v179_v28, %v180_v34  ;;  %v168_v42 = vand.u32 4294901760, %v167_v32  ;;  %p1016_p11 = por %p1015_p10, %p1014_p9 }
  0x1d   :  { %v161_v41 = vand.u32 4294901760, %v160_v31  ;;  %v194_v46 = vand.u32 4294901760, %v193_v40  ;;  %v200_v48 = vsub.f32 %v48_v17, %v81_v21  ;;  %v207_v49 = vsub.f32 %v49_v18, %v84_v22 }
  0x1e   :  { %929 = vmatpush3.bf16.msra.mxu0 %v1079_v14  ;;  %v175_v43 = vand.u32 4294901760, %v174_v36  ;;  %v182_v44 = vand.u32 4294901760, %v181_v37  ;;  %v188_v51 = vsub.f32 %v186_v39, %v187_v45  ;;  %v938_v53 = vpack.c.bf16 %v166_v26, %v159_v25  ;;  %p1017_p12 = pnand %p1016_p11, %p1010_p8 }
  0x1f   :  { %881 = vmatpush3.bf16.msra.mxu1 %v1079_v14  ;;  %931 = vmatprep.subr.bf16.mxu0 %v1091_v23  ;;  %v946_v50 = vpack.c.bf16 %v194_v46, %v187_v45  ;;  %v195_v52 = vsub.f32 %v193_v40, %v194_v46  ;;  %v890_v54 = vpack.c.bf16 %v168_v42, %v161_v41  ;;  %v201_v55 = vand.u32 4294901760, %v200_v48 }
  0x20   :  { %883 = vmatprep.subr.bf16.mxu1 %v1091_v23  ;;  %v1114_v47 = vpack.c.bf16 %v182_v44, %v175_v43  ;;  %v208_v56 = vand.u32 4294901760, %v207_v49  ;;  %v189_v57 = vand.u32 4294901760, %v188_v51  ;;  %v906_v2 = vpack.c.bf16 %v1083_v20, %v1081_v19 }
  0x21   :  { %v196_v58 = vand.u32 4294901760, %v195_v52  ;;  %v202_v60 = vsub.f32 %v200_v48, %v201_v55  ;;  %v910_v3 = vpack.c.bf16 %v179_v28, %v172_v27  ;;  %v1124_v4 = vpack.c.bf16 %v193_v40, %v186_v39 }
  0x22   :  { %933 = vmatpush3.bf16.msra.mxu0 %v1091_v23  ;;  %v950_v59 = vpack.c.bf16 %v208_v56, %v201_v55  ;;  %v209_v61 = vsub.f32 %v207_v49, %v208_v56  ;;  %v1126_v5 = vpack.c.bf16 %v207_v49, %v200_v48  ;;  %v28_v6 = vlaneseq }
  0x23   :  { %885 = vmatpush3.bf16.msra.mxu1 %v1091_v23  ;;  %935 = vmatprep.subr.bf16.mxu0 %v1097_v29  ;;  %v898_v62 = vpack.c.bf16 %v196_v58, %v189_v57  ;;  %v203_v63 = vand.u32 4294901760, %v202_v60  ;;  %v1039_v9 = vmov 0.0   ;;  %v214_v26 = vsub.f32 %v1099_v30, %v1110_v38 }
  0x24   :  { %887 = vmatprep.subr.bf16.mxu1 %v1097_v29  ;;  %v210_v0 = vand.u32 4294901760, %v209_v61  ;;  %v29_v7 = vand.u32 127, %v28_v6 }
  0x25   :  { %v215_v27 = vand.u32 4294901760, %v214_v26 }
  0x26   :  { %937 = vmatpush3.bf16.msra.mxu0 %v1097_v29  ;;  %v902_v1 = vpack.c.bf16 %v210_v0, %v203_v63 }
  0x27   :  { %889 = vmatpush3.bf16.msra.mxu1 %v1097_v29  ;;  %827 = vmatprep.subr.mxu0 %v1110_v38  ;;  %v216_v28 = vsub.f32 %v214_v26, %v215_v27 }
  0x28   :  { %764 = vmatprep.subr.mxu1 %v1110_v38 }
  0x29   :  { %v217_v30 = vand.u32 4294901760, %v216_v28 }
  0x2a   :  { %828 = vmatpush3.msra.mxu0 %v1110_v38 }
  0x2b   :  { %765 = vmatpush3.msra.mxu1 %v1110_v38  ;;  %939 = vmatprep.subr.bf16.mxu0 %v938_v53 }
  0x2c   :  { %891 = vmatprep.subr.bf16.mxu1 %v890_v54 }
  0x94   :  { %v32_v8 = vpop.permute.xlu0 %31 }
  0x95   :  { %vm36_vm2 = vcmp.eq.s32.totalorder %v29_v7, %v32_v8 }
  0x96   :  { %v674_v10 = vsel %vm36_vm2, 1.0, %v1039_v9 }
  0x97   :  { %v53_v11 = vsel %vm51_vm1, %v674_v10, 0 }
  0x98   :  { %v137_v12 = vsub.f32 %v53_v11, %v53_v11  ;;  %v35_v15 = vpop.permute.xlu0 %34 }
  0x99   :  { %vm37_vm3 = vcmp.eq.s32.totalorder %v29_v7, %v35_v15 }
  0x9a   :  { %v675_v16 = vsel %vm37_vm3, 1.0, %v1039_v9  ;;  %v138_v17 = vand.u32 4294901760, %v137_v12 }
  0x9b   :  { %v56_v18 = vsel %vm51_vm1, %v675_v16, 0 }
  0x9c   :  { %v147_v19 = vsub.f32 %v56_v18, %v56_v18  ;;  %829 = vmatprep.mubr.f32.mxu0 %v138_v17  ;;  %v139_v20 = vsub.f32 %v137_v12, %v138_v17 }
  0x9e   :  { %v140_v21 = vand.u32 4294901760, %v139_v20  ;;  %v148_v22 = vand.u32 4294901760, %v147_v19 }
  0xa0   :  { %766 = vmatprep.mubr.f32.mxu1 %v140_v21  ;;  %830 = vmatmul.mubr.f32.vlgmr.msra.gmra.mrb[0].mxu0 %v148_v22  ;;  %v149_v24 = vsub.f32 %v147_v19, %v148_v22 }
  0xa1   :  { %941 = vmatpush3.bf16.msra.mxu0 %v938_v53  ;;  %850 = vmatprep.mubr.msk.f32.mxu0 %vm51_vm1, %v674_v10 }
  0xa2   :  { %943 = vmatprep.subr.bf16.mxu0 %v1105_v35  ;;  %v150_v25 = vand.u32 4294901760, %v149_v24 }
  0xa4   :  { %767 = vmatmul.mubr.f32.vlgmr.msra.gmra.mrb[0].mxu1 %v150_v25 }
  0xa5   :  { %893 = vmatpush3.bf16.msra.mxu1 %v890_v54  ;;  %945 = vmatpush3.bf16.msra.mxu0 %v1105_v35 }
  0xa6   :  { %787 = vmatprep.mubr.msk.f32.mxu1 %vm51_vm1, %v674_v10  ;;  %895 = vmatprep.subr.bf16.mxu1 %v1114_v47 }
  0xa7   :  { %947 = vmatprep.subr.bf16.mxu0 %v946_v50 }
  0xa9   :  { %897 = vmatpush3.bf16.msra.mxu1 %v1114_v47  ;;  %949 = vmatpush3.bf16.msra.mxu0 %v946_v50 }
  0xaa   :  { %899 = vmatprep.subr.bf16.mxu1 %v898_v62  ;;  %951 = vmatprep.subr.bf16.mxu0 %v950_v59 }
  0xad   :  { %901 = vmatpush3.bf16.msra.mxu1 %v898_v62  ;;  %953 = vmatpush3.bf16.msra.mxu0 %v950_v59 }
  0xae   :  { %903 = vmatprep.subr.bf16.mxu1 %v902_v1  ;;  %848 = vmatprep.subr.mxu0 %v215_v27 }
  0xb1   :  { %905 = vmatpush3.bf16.msra.mxu1 %v902_v1  ;;  %849 = vmatpush3.msra.mxu0 %v215_v27 }
  0xb2   :  { %851 = vmatmul.mubr.msk.f32.vlgmr.msra.gmra.mrb[0].mxu0 %vm51_vm1, %v675_v16  ;;  %955 = vmatprep.subr.bf16.mxu0 %v1077_v13 }
  0xb3   :  { %957 = vmatpush3.bf16.msra.mxu0 %v1077_v13  ;;  %871 = vmatprep.mubr.msk.f32.mxu0 %vm51_vm1, %v674_v10 }
  0xb4   :  { %785 = vmatprep.subr.mxu1 %v217_v30  ;;  %959 = vmatprep.subr.bf16.mxu0 %v1079_v14 }
  0xb5   :  { %786 = vmatpush3.msra.mxu1 %v217_v30 }
  0xb6   :  { %788 = vmatmul.mubr.msk.f32.vlgmr.msra.gmra.mrb[0].mxu1 %vm51_vm1, %v675_v16  ;;  %907 = vmatprep.subr.bf16.mxu1 %v906_v2 }
  0xb7   :  { %909 = vmatpush3.bf16.msra.mxu1 %v906_v2  ;;  %808 = vmatprep.mubr.f32.mxu1 %v137_v12 }
  0xb8   :  { %961 = vmatpush3.bf16.msra.mxu0 %v1079_v14  ;;  %911 = vmatprep.subr.bf16.mxu1 %v910_v3 }
  0xb9   :  { %963 = vmatprep.subr.bf16.mxu0 %v1091_v23 }
  0xbb   :  { %913 = vmatpush3.bf16.msra.mxu1 %v910_v3 }
  0xbc   :  { %965 = vmatpush3.bf16.msra.mxu0 %v1091_v23  ;;  %915 = vmatprep.subr.bf16.mxu1 %v1124_v4 }
  0xbd   :  { %967 = vmatprep.subr.bf16.mxu0 %v1097_v29 }
  0xbf   :  { %917 = vmatpush3.bf16.msra.mxu1 %v1124_v4 }
  0xc0   :  { %969 = vmatpush3.bf16.msra.mxu0 %v1097_v29  ;;  %919 = vmatprep.subr.bf16.mxu1 %v1126_v5 }
  0xc1   :  { %869 = vmatprep.subr.mxu0 %v1110_v38 }
  0xc3   :  { %921 = vmatpush3.bf16.msra.mxu1 %v1126_v5 }
  0xc4   :  { %870 = vmatpush3.msra.mxu0 %v1110_v38  ;;  %806 = vmatprep.subr.mxu1 %v214_v26 }
  0xc5   :  { %872 = vmatmul.mubr.msk.f32.vlgmr.msra.gmra.mrb[0].mxu0 %vm51_vm1, %v675_v16 }
  0xc7   :  { %807 = vmatpush3.msra.mxu1 %v214_v26 }
  0xc8   :  { %809 = vmatmul.mubr.f32.vlgmr.msra.gmra.mrb[0].mxu1 %v147_v19 }
 0x198   :  { %v873_v13 = vpop.f32.mrb[0].mxu0 }
 0x199   :  { %v645_v14 = vpop.f32.mrb[1].mxu0 }
 0x19b   :  { %v810_v23 = vpop.f32.mrb[0].mxu1 }
 0x19c   :  { %v970_v31 = vadd.f32 %v873_v13, %v810_v23  ;;  %v364_v29 = vpop.f32.mrb[1].mxu1 }
 0x19d   :  { %v971_v32 = vadd.f32 %v645_v14, %v364_v29 }
 0x19e   :  { %656 = vst.msk [vmem:[#allocation5 + $0x8] sm:$0xff] %vm51_vm1, %v970_v31 }
 0x19f   :  { %655 = vst.msk [vmem:[#allocation5] sm:$0xff] %vm51_vm1, %v971_v32 }
 0x1a0   :  { %1020 = shalt.err (!%p1017_p12)
}
 0x1a1   :  { %s1021_s30 = scalar_lea.hbm %s1175_s2, 256 }
 0x1a2   :  { %p1022_p13 = scmp.ne.s32.totalorder %s1175_s2, %s1021_s30  ;;  %p1025_p0 = scmp.lt.u32.totalorder %s1021_s30, %s1175_s2 }
 0x1a4   :  { %p1027_p1 = pnand %p1025_p0, %p1022_p13 }
 0x1a6   :  { %1030 = shalt.err (!%p1027_p1)
}
 0x1a7   :  { %668 = dma.vmem_to_hbm [thread:$0]  %s663_s1, 256, %s1175_s2, [#allocation4], %s1036_s19, %s1036_s19, %s1037_s20  }
 0x1a8   :  { %1033 = dma.done.wait [#allocation4], 256  }
 0x1a9   :  { %1034 = vsyncadd [#allocation4], 4294967040 }
 0x1aa   :  { %672 = vsyncpa [#allocation3], 1 }
 0x1ab   :  { %673 = vsyncpa [#allocation4], 1 }

</bundles_post_ra>
